<compile_context>
chip_gen: v6e
topology: v6e:2x2x1
jax: 0.10.0
libtpu: 0.0.40
codegen_flags: <defaults>
</compile_context>

<pallas_src>
import jax
import jax.numpy as jnp
from jax.experimental import pallas as pl
from jax.experimental.pallas import tpu as pltpu


def _copy_kernel(x_ref, o_ref):
    # Lane-dense identity copy of one [tile_rows, q] slab.
    o_ref[...] = x_ref[...]


class Unflatten:
    """JAX/Pallas port of ummon Unflatten (no parameters)."""

    def __init__(self, insize, outsize):
        if isinstance(insize, list):
            if len(insize) != 1:
                raise TypeError('Input size list must have 1 element.')
            self.insize = int(insize[0])
        else:
            self.insize = int(insize)
        self.outsize = [int(s) for s in outsize]
        if len(self.outsize) not in (2, 3):
            raise TypeError('Output size list must have 2 or 3 elements.')
        for s in self.outsize:
            if s < 1:
                raise ValueError('Output size must be > 0.')
        prod = 1
        for s in self.outsize:
            prod *= s
        if self.insize != prod:
            raise ValueError('Input size must be the product of the input sizes.')

    def __call__(self, x, use_pallas_copy=True):
        # x: [B, insize]
        assert x.ndim == 2 and x.shape[1] == self.insize, \
            f"expected [B, {self.insize}], got {x.shape}"
        B, q = x.shape
        out_shape = (B, *self.outsize)

        if not use_pallas_copy:
            # Fastest path: metadata-only reshape, zero bytes moved.
            return jnp.reshape(x, out_shape)

        itemsize = jnp.dtype(x.dtype).itemsize
        # Sublane packing: 8 rows for 32-bit, 16 for 16-bit, 32 for 8-bit.
        sublane = max(8, 32 // itemsize)

        # Target ~1 MiB per block: >=85% of HBM roofline on v6e, fits the
        # default scoped VMEM with double-buffered in+out on every generation
        # (4 live tiles ~= 4 MiB << 16 MiB v5e default).
        target_bytes = 1 << 20
        rows = (target_bytes // max(1, q * itemsize)) // sublane * sublane
        rows = max(sublane, rows)

        if rows >= B:
            # Whole batch in one block; full-dim block shape satisfies the
            # (8, 128) rule regardless of B.
            tile_rows = B
        else:
            tile_rows = rows  # partial last block handled by Pallas

        grid = (pl.cdiv(B, tile_rows),)

        flat = pl.pallas_call(
            _copy_kernel,
            out_shape=jax.ShapeDtypeStruct((B, q), x.dtype),
            grid=grid,
            in_specs=[pl.BlockSpec((tile_rows, q), lambda i: (i, 0))],
            out_specs=pl.BlockSpec((tile_rows, q), lambda i: (i, 0)),
            compiler_params=pltpu.CompilerParams(
                dimension_semantics=("parallel",)),
            cost_estimate=pl.CostEstimate(
                flops=0,
                transcendentals=0,
                bytes_accessed=2 * B * q * itemsize),
        )(x)

        # Free metadata reshape in the wrapper — keeps the kernel output
        # lane-dense (last dim q, unmasked full-lane stores).
        return jnp.reshape(flat, out_shape)


if __name__ == "__main__":
    key = jax.random.PRNGKey(0)
    k1, k2, k3 = jax.random.split(key, 3)

    # 3-element outsize case: [B, 4*16*16] -> [B, 4, 16, 16]
    B, m, n, p = 2, 4, 16, 16
    x3 = jax.random.normal(k1, (B, m * n * p), dtype=jnp.float32)
    unflat3 = Unflatten([m * n * p], [m, n, p])
    y3 = jax.block_until_ready(unflat3(x3))
    assert y3.shape == (B, m, n, p)
    assert jnp.allclose(y3, x3.reshape(B, m, n, p))

    # 2-element outsize case: [B, 8*32] -> [B, 8, 32]
    m2, n2 = 8, 32
    x2 = jax.random.normal(k2, (B, m2 * n2), dtype=jnp.float32)
    unflat2 = Unflatten(m2 * n2, [m2, n2])
    y2 = jax.block_until_ready(unflat2(x2))
    assert y2.shape == (B, m2, n2)
    assert jnp.allclose(y2, x2.reshape(B, m2, n2))

    # bf16 case with a non-multiple-of-sublane batch (exercises dtype-aware
    # tiling + full-dim block rule): [10, 4*16*16] -> [10, 4, 16, 16]
    Bb = 10
    xb = jax.random.normal(k3, (Bb, m * n * p), dtype=jnp.float32).astype(jnp.bfloat16)
    yb = jax.block_until_ready(unflat3(xb))
    assert yb.shape == (Bb, m, n, p)
    assert jnp.array_equal(yb, xb.reshape(Bb, m, n, p))

    print("KERNEL_OK")
</pallas_src>

<mosaic_0001>
module attributes {stable_mosaic.version = 11 : i64} {
  func.func @_copy_kernel(%arg0: i32, %arg1: memref<2x1024xf32, #tpu.memory_space<vmem>>, %arg2: memref<2x1024xf32, #tpu.memory_space<vmem>>) attributes {dimension_semantics = [#tpu.dimension_semantics<parallel>], iteration_bounds = array<i64: 1>, scalar_prefetch = 0 : i64, scratch_operands = 0 : i64, tpu.core_type = #tpu.core_type<tc>, window_params = [{transform_indices = @transform_0, window_bounds = array<i64: 2, 1024>}, {transform_indices = @transform_1, window_bounds = array<i64: 2, 1024>}]} {
    %c0 = arith.constant 0 : index
    %c0_0 = arith.constant 0 : index
    %0 = vector.load %arg1[%c0, %c0_0] : memref<2x1024xf32, #tpu.memory_space<vmem>>, vector<2x1024xf32>
    %c0_1 = arith.constant 0 : index
    %c0_2 = arith.constant 0 : index
    %1 = vector.load %arg2[%c0_1, %c0_2] : memref<2x1024xf32, #tpu.memory_space<vmem>>, vector<2x1024xf32>
    tpu.vector_store %arg2[%c0_1, %c0_2], %0 {strides = array<i32>} : memref<2x1024xf32, #tpu.memory_space<vmem>>, vector<2x1024xf32>,
    return
  }
  func.func @transform_0(%arg0: i32) -> (i32, i32) {
    %c0_i32 = arith.constant 0 : i32
    %c0_i32_0 = arith.constant 0 : i32
    return %arg0, %c0_i32 : i32, i32
  }
  func.func @transform_1(%arg0: i32) -> (i32, i32) {
    %c0_i32 = arith.constant 0 : i32
    %c0_i32_0 = arith.constant 0 : i32
    return %arg0, %c0_i32 : i32, i32
  }
}

</mosaic_0001>

<bundles_post_ra>
// kernel: tpu_custom_call.1
= control target key start
LH: loop header
LB: loop body
LE: loop exit
PB: predicated region body
PF: predicated region fallthrough
CT: control target
= control target key end

     0   :  { %6 = vsyncpa [#allocation3], 0  ;;  %s104_s0 = inlined_call_operand.hbm [shape: f32[2,1024], index: 0, kind: input, shape index: {}]   ;;  %s105_s1 = inlined_call_operand.hbm [shape: f32[2,1024], index: 1, kind: output, shape index: {}]  }
   0x1   :  { %7 = vsyncpa [#allocation4], 0  ;;  %s86_s6 = smov [#allocation2]  }
   0x2   :  { %s14_s7 = sshll.u32 %s86_s6, 4  ;;  %s15_s7 = int_to_ptr.vmem [resolvable:$true] %s14_s7 }
   0x3   :  { %s50_s8 = scalar_lea.vmem %s15_s7, 256  ;;  %p55_p1 = scmp.lt.s32.totalorder %s15_s7, %s15_s7 }
   0x4   :  { %p51_p0 = scmp.ne.s32.totalorder %s15_s7, %s50_s8  ;;  %p56_p2 = scmp.lt.s32.totalorder %s50_s8, %s50_s8 }
   0x6   :  { %p57_p3 = por %p56_p2, %p55_p1 }
   0x8   :  { %p58_p4 = pnand %p57_p3, %p51_p0 }
   0xa   :  { %61 = shalt.err (!%p58_p4)
}
   0xb   :  { %17 = dma.hbm_to_vmem [thread:$0]  %s104_s0, 256, %s15_s7, [#allocation3]  }
   0xc   :  { %82 = dma.done.wait [#allocation3], 256  }
   0xd   :  { %83 = vsyncadd [#allocation3], 4294967040  ;;  %s87_s11 = smov [#allocation5]   ;;  %v21_v0 = vld [vmem:[#allocation2] sm:$0xff]  ;;  %v22_v1 = vld [vmem:[#allocation2 + $0x8] sm:$0xff] }
   0xe   :  { %s31_s12 = sshll.u32 %s87_s11, 4  ;;  %23 = vst [vmem:[#allocation5] sm:$0xff] %v21_v0  ;;  %24 = vst [vmem:[#allocation5 + $0x8] sm:$0xff] %v22_v1  ;;  %s32_s12 = int_to_ptr.vmem [resolvable:$true] %s31_s12 }
   0xf   :  { %s62_s13 = scalar_lea.vmem %s32_s12, 256  ;;  %p67_p6 = scmp.lt.s32.totalorder %s32_s12, %s32_s12 }
  0x10   :  { %p63_p5 = scmp.ne.s32.totalorder %s32_s12, %s62_s13  ;;  %p68_p7 = scmp.lt.s32.totalorder %s62_s13, %s62_s13 }
  0x12   :  { %p69_p8 = por %p68_p7, %p67_p6 }
  0x14   :  { %p70_p9 = pnand %p69_p8, %p63_p5 }
  0x16   :  { %73 = shalt.err (!%p70_p9)
}
  0x17   :  { %34 = dma.vmem_to_hbm [thread:$0]  %s32_s12, 256, %s105_s1, [#allocation4]  }
  0x18   :  { %84 = dma.done.wait [#allocation4], 256  }
  0x19   :  { %85 = vsyncadd [#allocation4], 4294967040 }
  0x1a   :  { %38 = vsyncpa [#allocation3], 1 }
  0x1b   :  { %39 = vsyncpa [#allocation4], 1 }

</bundles_post_ra>
